<compile_context>
chip_gen: v5e
topology: v5e:2x2
jax: 0.10.0
libtpu: 0.0.40
codegen_flags: <defaults>
</compile_context>

<pallas_src>
import jax
import jax.numpy as jnp
from jax.experimental import pallas as pl
from jax.experimental.pallas import tpu as pltpu


def _round_up(x, m):
    return ((x + m - 1) // m) * m


def _lane_multiple():
    """MXU-friendly N padding: 256 on v6e/v7x (2x256x256 MXU), 128 on v2-v5."""
    try:
        kind = jax.devices()[0].device_kind.lower()
    except Exception:
        return 128
    for old in ("v2", "v3", "v4", "v5"):
        if old in kind:
            return 128
    return 256


def _vmem_cap_bytes():
    """~80% of physical VMEM (~51 MiB on v7x, ~102 MiB on v5e/v6e)."""
    try:
        return int(0.8 * pltpu.get_tpu_info().vmem_capacity_bytes)
    except Exception:
        return 48 << 20  # safe on every generation incl. v7x (64 MiB physical)


def prepare_block_params(w1, b1, w2, b2, *, use_bf16=True, lane_multiple=None):
    """One-time weight prep: pad the D axis to an MXU-friendly multiple and
    cast to the compute dtype. Call once at init; reuse across forwards.

    w1: (input_dim, D), w2: (D, D)  -- transpose of torch nn.Linear.weight.
    b1, b2: (D,)

    Note: use_bf16=True runs the matmuls in bf16 with f32 accumulation
    (~1e-3 relative error vs the f32 PyTorch Block); pass use_bf16=False for
    full f32 matmuls.
    """
    input_dim, D = w1.shape
    assert w2.shape == (D, D) and b1.shape == (D,) and b2.shape == (D,)
    lane = lane_multiple or _lane_multiple()
    Dp = _round_up(D, lane)
    cdt = jnp.bfloat16 if use_bf16 else jnp.float32

    # Zero padding is numerically inert: padded hidden columns are relu(0)=0
    # and padded w2 rows contribute 0 to the real output columns.
    w1p = jnp.zeros((input_dim, Dp), cdt).at[:, :D].set(w1.astype(cdt))
    w2p = jnp.zeros((Dp, Dp), cdt).at[:D, :D].set(w2.astype(cdt))
    b1p = jnp.zeros((1, Dp), jnp.float32).at[0, :D].set(b1.astype(jnp.float32))
    b2p = jnp.zeros((1, Dp), jnp.float32).at[0, :D].set(b2.astype(jnp.float32))
    return dict(w1=w1p, b1=b1p, w2=w2p, b2=b2p,
                input_dim=input_dim, D=D, Dp=Dp, compute_dtype=cdt)


def _block_kernel(x_ref, w1_ref, b1_ref, w2_ref, b2_ref, o_ref):
    # Cast the f32 activation tile to the compute dtype in-kernel (VPU cast;
    # avoids a separate XLA convert pass over x in HBM).
    x = x_ref[...].astype(w1_ref.dtype)
    # fc1: MXU matmul with f32 accumulation, bias + ReLU in f32 on the VPU.
    h = jnp.dot(x, w1_ref[...], preferred_element_type=jnp.float32)
    h = jnp.maximum(h + b1_ref[...], 0.0)
    # fc2: feed hidden activations back through the MXU in the compute dtype.
    h = h.astype(w2_ref.dtype)
    y = jnp.dot(h, w2_ref[...], preferred_element_type=jnp.float32)
    y = jnp.maximum(y + b2_ref[...], 0.0)
    o_ref[...] = y.astype(o_ref.dtype)


def _resident_spec(shape, nbuf):
    """Constant-index (VMEM-resident) BlockSpec, optionally single-buffered."""
    index_map = lambda i: tuple(0 for _ in shape)
    if nbuf is None:
        return pl.BlockSpec(shape, index_map)
    return pl.BlockSpec(shape, index_map, pipeline_mode=pl.Buffered(nbuf))


def block_forward(x, params, *, tm_max=256, out_dtype=jnp.float32):
    """x: (B, input_dim) f32 -> (B, D, 1), matching PyTorch Block.forward."""
    B, input_dim = x.shape
    assert input_dim == params["input_dim"]
    D, Dp = params["D"], params["Dp"]
    w1p, b1p, w2p, b2p = params["w1"], params["b1"], params["w2"], params["b2"]
    w_itemsize = jnp.dtype(params["compute_dtype"]).itemsize
    out_itemsize = jnp.dtype(out_dtype).itemsize

    # Batch tile: full batch when it fits (single grid step, zero padding),
    # otherwise tm_max-row tiles (multiple of 256 -> full MXU M passes).
    # A non-dividing last block is handled by Pallas partial-block masking,
    # so no explicit batch padding / wasted DMA+MXU rows.
    TM = B if B <= tm_max else tm_max
    grid = (pl.cdiv(B, TM),)

    # VMEM budget: double-buffered x/out tiles + single-buffered resident
    # weights + the f32 hidden tile, plus headroom, capped at ~80% of VMEM.
    vmem_needed = (
        2 * TM * input_dim * 4                       # x tile (f32, 2 buffers)
        + 2 * TM * Dp * out_itemsize                 # out tile (2 buffers)
        + (input_dim * Dp + Dp * Dp) * w_itemsize    # weights (resident)
        + 2 * Dp * 4                                 # biases
        + TM * Dp * 4                                # f32 hidden intermediate
    )
    vmem_limit = int(min(max(vmem_needed + (4 << 20), 32 << 20),
                         _vmem_cap_bytes()))

    cost = pl.CostEstimate(
        flops=2 * B * (input_dim * Dp + Dp * Dp),
        transcendentals=0,
        bytes_accessed=int(
            B * input_dim * 4                        # x (f32 in)
            + (input_dim * Dp + Dp * Dp) * w_itemsize
            + 2 * Dp * 4
            + B * Dp * out_itemsize
        ),
    )

    def _call(weight_buffers):
        in_specs = [
            pl.BlockSpec((TM, input_dim), lambda i: (i, 0)),     # x: batch-tiled
            _resident_spec((input_dim, Dp), weight_buffers),     # w1
            _resident_spec((1, Dp), weight_buffers),             # b1
            _resident_spec((Dp, Dp), weight_buffers),            # w2
            _resident_spec((1, Dp), weight_buffers),             # b2
        ]
        return pl.pallas_call(
            _block_kernel,
            out_shape=jax.ShapeDtypeStruct((B, Dp), out_dtype),
            grid_spec=pltpu.PrefetchScalarGridSpec(
                num_scalar_prefetch=0,
                grid=grid,
                in_specs=in_specs,
                out_specs=pl.BlockSpec((TM, Dp), lambda i: (i, 0)),
            ),
            compiler_params=pltpu.CompilerParams(
                # batch axis is embarrassingly parallel -> shards across both
                # TensorCores on v7x; no-op on single-TC v5e/v6e.
                dimension_semantics=("parallel",),
                vmem_limit_bytes=vmem_limit,
            ),
            cost_estimate=cost,
        )(x, w1p, b1p, w2p, b2p)

    try:
        out2d = _call(1)       # single-buffer the resident weights/biases
    except Exception:          # pragma: no cover - older JAX without Buffered(1)
        out2d = _call(None)    # fall back to default double-buffering

    # strip D padding; unsqueeze(-1) is pure shape glue, stays in JAX.
    return out2d[:, :D, None]


def _init_linear(key, in_features, out_features):
    """Deterministic init mimicking nn.Linear default (uniform +-1/sqrt(fan_in)).
    Returns weight in (in_features, out_features) layout (PyTorch transposed)."""
    kw, kb = jax.random.split(key)
    bound = 1.0 / jnp.sqrt(jnp.float32(in_features))
    w = jax.random.uniform(kw, (in_features, out_features), jnp.float32,
                           minval=-bound, maxval=bound)
    b = jax.random.uniform(kb, (out_features,), jnp.float32,
                           minval=-bound, maxval=bound)
    return w, b


if __name__ == "__main__":
    key = jax.random.PRNGKey(0)
    k_x, k_fc1, k_fc2 = jax.random.split(key, 3)

    batch = 8
    input_dim = 32
    D = 32

    x = jax.random.normal(k_x, (batch, input_dim), jnp.float32)
    w1, b1 = _init_linear(k_fc1, input_dim, D)
    w2, b2 = _init_linear(k_fc2, D, D)

    # One-time weight prep (padding + bf16 cast hoisted out of the forward).
    params = prepare_block_params(w1, b1, w2, b2, use_bf16=True)

    out = jax.block_until_ready(block_forward(x, params))

    # reference with the same bf16-in / f32-accumulate contraction
    xb, w1b, w2b = (t.astype(jnp.bfloat16) for t in (x, w1, w2))
    h_ref = jnp.maximum(
        jnp.dot(xb, w1b, preferred_element_type=jnp.float32) + b1, 0.0)
    ref = jnp.maximum(
        jnp.dot(h_ref.astype(jnp.bfloat16), w2b,
                preferred_element_type=jnp.float32) + b2, 0.0)[..., None]

    assert out.shape == (batch, D, 1)
    assert jnp.allclose(out, ref, atol=1e-3, rtol=1e-3), float(
        jnp.max(jnp.abs(out - ref)))

    print("KERNEL_OK")
</pallas_src>

<mosaic_0001>
module attributes {stable_mosaic.version = 11 : i64} {
  func.func @_block_kernel(%arg0: i32, %arg1: memref<8x32xf32, #tpu.memory_space<vmem>>, %arg2: memref<32x256xbf16, #tpu.memory_space<vmem>>, %arg3: memref<1x256xf32, #tpu.memory_space<vmem>>, %arg4: memref<256x256xbf16, #tpu.memory_space<vmem>>, %arg5: memref<1x256xf32, #tpu.memory_space<vmem>>, %arg6: memref<8x256xf32, #tpu.memory_space<vmem>>) attributes {dimension_semantics = [#tpu.dimension_semantics<parallel>], iteration_bounds = array<i64: 1>, scalar_prefetch = 0 : i64, scratch_operands = 0 : i64, tpu.core_type = #tpu.core_type<tc>, window_params = [{transform_indices = @transform_0, window_bounds = array<i64: 8, 32>}, {pipeline_mode = #tpu.pipeline_mode<synchronous>, transform_indices = @transform_1, window_bounds = array<i64: 32, 256>}, {pipeline_mode = #tpu.pipeline_mode<synchronous>, transform_indices = @transform_2, window_bounds = array<i64: 1, 256>}, {pipeline_mode = #tpu.pipeline_mode<synchronous>, transform_indices = @transform_3, window_bounds = array<i64: 256, 256>}, {pipeline_mode = #tpu.pipeline_mode<synchronous>, transform_indices = @transform_4, window_bounds = array<i64: 1, 256>}, {transform_indices = @transform_5, window_bounds = array<i64: 8, 256>}]} {
    %c0 = arith.constant 0 : index
    %c0_0 = arith.constant 0 : index
    %0 = vector.load %arg1[%c0, %c0_0] : memref<8x32xf32, #tpu.memory_space<vmem>>, vector<8x32xf32>
    %1 = arith.truncf %0 : vector<8x32xf32> to vector<8x32xbf16>
    %c0_1 = arith.constant 0 : index
    %c0_2 = arith.constant 0 : index
    %2 = vector.load %arg2[%c0_1, %c0_2] : memref<32x256xbf16, #tpu.memory_space<vmem>>, vector<32x256xbf16>
    %cst = arith.constant dense<0.000000e+00> : vector<8x256xf32>
    %3 = tpu.matmul %1, %2, %cst {dimension_numbers = #tpu.dot_dimension_numbers<[1], [0], [0], [1], [0, 0, 1, 1], [], []>} : vector<8x32xbf16>, vector<32x256xbf16>, vector<8x256xf32> -> vector<8x256xf32>
    %c0_3 = arith.constant 0 : index
    %c0_4 = arith.constant 0 : index
    %4 = vector.load %arg3[%c0_3, %c0_4] : memref<1x256xf32, #tpu.memory_space<vmem>>, vector<1x256xf32>
    %5 = vector.broadcast %4 : vector<1x256xf32> to vector<8x256xf32>
    %6 = arith.addf %3, %5 : vector<8x256xf32>
    %cst_5 = arith.constant 0.000000e+00 : f32
    %7 = vector.broadcast %cst_5 : f32 to vector<8x256xf32>
    %8 = arith.maximumf %6, %7 : vector<8x256xf32>
    %9 = arith.truncf %8 : vector<8x256xf32> to vector<8x256xbf16>
    %c0_6 = arith.constant 0 : index
    %c0_7 = arith.constant 0 : index
    %10 = vector.load %arg4[%c0_6, %c0_7] : memref<256x256xbf16, #tpu.memory_space<vmem>>, vector<256x256xbf16>
    %cst_8 = arith.constant dense<0.000000e+00> : vector<8x256xf32>
    %11 = tpu.matmul %9, %10, %cst_8 {dimension_numbers = #tpu.dot_dimension_numbers<[1], [0], [0], [1], [0, 0, 1, 1], [], []>} : vector<8x256xbf16>, vector<256x256xbf16>, vector<8x256xf32> -> vector<8x256xf32>
    %c0_9 = arith.constant 0 : index
    %c0_10 = arith.constant 0 : index
    %12 = vector.load %arg5[%c0_9, %c0_10] : memref<1x256xf32, #tpu.memory_space<vmem>>, vector<1x256xf32>
    %13 = vector.broadcast %12 : vector<1x256xf32> to vector<8x256xf32>
    %14 = arith.addf %11, %13 : vector<8x256xf32>
    %cst_11 = arith.constant 0.000000e+00 : f32
    %15 = vector.broadcast %cst_11 : f32 to vector<8x256xf32>
    %16 = arith.maximumf %14, %15 : vector<8x256xf32>
    %c0_12 = arith.constant 0 : index
    %c0_13 = arith.constant 0 : index
    %17 = vector.load %arg6[%c0_12, %c0_13] : memref<8x256xf32, #tpu.memory_space<vmem>>, vector<8x256xf32>
    tpu.vector_store %arg6[%c0_12, %c0_13], %16 {strides = array<i32>} : memref<8x256xf32, #tpu.memory_space<vmem>>, vector<8x256xf32>,
    return
  }
  func.func @transform_0(%arg0: i32) -> (i32, i32) {
    %c0_i32 = arith.constant 0 : i32
    %c0_i32_0 = arith.constant 0 : i32
    return %arg0, %c0_i32 : i32, i32
  }
  func.func @transform_1(%arg0: i32) -> (i32, i32) {
    %c0_i32 = arith.constant 0 : i32
    %c0_i32_0 = arith.constant 0 : i32
    %c0_i32_1 = arith.constant 0 : i32
    return %c0_i32, %c0_i32_0 : i32, i32
  }
  func.func @transform_2(%arg0: i32) -> (i32, i32) {
    %c0_i32 = arith.constant 0 : i32
    %c0_i32_0 = arith.constant 0 : i32
    %c0_i32_1 = arith.constant 0 : i32
    return %c0_i32, %c0_i32_0 : i32, i32
  }
  func.func @transform_3(%arg0: i32) -> (i32, i32) {
    %c0_i32 = arith.constant 0 : i32
    %c0_i32_0 = arith.constant 0 : i32
    %c0_i32_1 = arith.constant 0 : i32
    return %c0_i32, %c0_i32_0 : i32, i32
  }
  func.func @transform_4(%arg0: i32) -> (i32, i32) {
    %c0_i32 = arith.constant 0 : i32
    %c0_i32_0 = arith.constant 0 : i32
    %c0_i32_1 = arith.constant 0 : i32
    return %c0_i32, %c0_i32_0 : i32, i32
  }
  func.func @transform_5(%arg0: i32) -> (i32, i32) {
    %c0_i32 = arith.constant 0 : i32
    %c0_i32_0 = arith.constant 0 : i32
    return %arg0, %c0_i32 : i32, i32
  }
}

module attributes {stable_mosaic.version = 11 : i64} {
  func.func @_block_kernel(%arg0: i32, %arg1: memref<8x32xf32, #tpu.memory_space<vmem>>, %arg2: memref<32x256xbf16, #tpu.memory_space<vmem>>, %arg3: memref<1x256xf32, #tpu.memory_space<vmem>>, %arg4: memref<256x256xbf16, #tpu.memory_space<vmem>>, %arg5: memref<1x256xf32, #tpu.memory_space<vmem>>, %arg6: memref<8x256xf32, #tpu.memory_space<vmem>>) attributes {dimension_semantics = [#tpu.dimension_semantics<parallel>], iteration_bounds = array<i64: 1>, scalar_prefetch = 0 : i64, scratch_operands = 0 : i64, tpu.core_type = #tpu.core_type<tc>, window_params = [{transform_indices = @transform_0, window_bounds = array<i64: 8, 32>}, {pipeline_mode = #tpu.pipeline_mode<synchronous>, transform_indices = @transform_1, window_bounds = array<i64: 32, 256>}, {pipeline_mode = #tpu.pipeline_mode<synchronous>, transform_indices = @transform_2, window_bounds = array<i64: 1, 256>}, {pipeline_mode = #tpu.pipeline_mode<synchronous>, transform_indices = @transform_3, window_bounds = array<i64: 256, 256>}, {pipeline_mode = #tpu.pipeline_mode<synchronous>, transform_indices = @transform_4, window_bounds = array<i64: 1, 256>}, {transform_indices = @transform_5, window_bounds = array<i64: 8, 256>}]} {
    %c0 = arith.constant 0 : index
    %c0_0 = arith.constant 0 : index
    %0 = vector.load %arg1[%c0, %c0_0] : memref<8x32xf32, #tpu.memory_space<vmem>>, vector<8x32xf32>
    %1 = arith.truncf %0 : vector<8x32xf32> to vector<8x32xbf16>
    %c0_1 = arith.constant 0 : index
    %c0_2 = arith.constant 0 : index
    %2 = vector.load %arg2[%c0_1, %c0_2] : memref<32x256xbf16, #tpu.memory_space<vmem>>, vector<32x256xbf16>
    %cst = arith.constant dense<0.000000e+00> : vector<8x256xf32>
    %3 = tpu.matmul %1, %2, %cst {dimension_numbers = #tpu.dot_dimension_numbers<[1], [0], [0], [1], [0, 0, 1, 1], [], []>} : vector<8x32xbf16>, vector<32x256xbf16>, vector<8x256xf32> -> vector<8x256xf32>
    %c0_3 = arith.constant 0 : index
    %c0_4 = arith.constant 0 : index
    %4 = vector.load %arg3[%c0_3, %c0_4] : memref<1x256xf32, #tpu.memory_space<vmem>>, vector<1x256xf32>
    %5 = vector.broadcast %4 : vector<1x256xf32> to vector<8x256xf32>
    %6 = arith.addf %3, %5 : vector<8x256xf32>
    %cst_5 = arith.constant 0.000000e+00 : f32
    %7 = vector.broadcast %cst_5 : f32 to vector<8x256xf32>
    %8 = arith.maximumf %6, %7 : vector<8x256xf32>
    %9 = arith.truncf %8 : vector<8x256xf32> to vector<8x256xbf16>
    %c0_6 = arith.constant 0 : index
    %c0_7 = arith.constant 0 : index
    %10 = vector.load %arg4[%c0_6, %c0_7] : memref<256x256xbf16, #tpu.memory_space<vmem>>, vector<256x256xbf16>
    %cst_8 = arith.constant dense<0.000000e+00> : vector<8x256xf32>
    %11 = tpu.matmul %9, %10, %cst_8 {dimension_numbers = #tpu.dot_dimension_numbers<[1], [0], [0], [1], [0, 0, 1, 1], [], []>} : vector<8x256xbf16>, vector<256x256xbf16>, vector<8x256xf32> -> vector<8x256xf32>
    %c0_9 = arith.constant 0 : index
    %c0_10 = arith.constant 0 : index
    %12 = vector.load %arg5[%c0_9, %c0_10] : memref<1x256xf32, #tpu.memory_space<vmem>>, vector<1x256xf32>
    %13 = vector.broadcast %12 : vector<1x256xf32> to vector<8x256xf32>
    %14 = arith.addf %11, %13 : vector<8x256xf32>
    %cst_11 = arith.constant 0.000000e+00 : f32
    %15 = vector.broadcast %cst_11 : f32 to vector<8x256xf32>
    %16 = arith.maximumf %14, %15 : vector<8x256xf32>
    %c0_12 = arith.constant 0 : index
    %c0_13 = arith.constant 0 : index
    %17 = vector.load %arg6[%c0_12, %c0_13] : memref<8x256xf32, #tpu.memory_space<vmem>>, vector<8x256xf32>
    tpu.vector_store %arg6[%c0_12, %c0_13], %16 {strides = array<i32>} : memref<8x256xf32, #tpu.memory_space<vmem>>, vector<8x256xf32>,
    return
  }
  func.func @transform_0(%arg0: i32) -> (i32, i32) {
    %c0_i32 = arith.constant 0 : i32
    %c0_i32_0 = arith.constant 0 : i32
    return %arg0, %c0_i32 : i32, i32
  }
  func.func @transform_1(%arg0: i32) -> (i32, i32) {
    %c0_i32 = arith.constant 0 : i32
    %c0_i32_0 = arith.constant 0 : i32
    %c0_i32_1 = arith.constant 0 : i32
    return %c0_i32, %c0_i32_0 : i32, i32
  }
  func.func @transform_2(%arg0: i32) -> (i32, i32) {
    %c0_i32 = arith.constant 0 : i32
    %c0_i32_0 = arith.constant 0 : i32
    %c0_i32_1 = arith.constant 0 : i32
    return %c0_i32, %c0_i32_0 : i32, i32
  }
  func.func @transform_3(%arg0: i32) -> (i32, i32) {
    %c0_i32 = arith.constant 0 : i32
    %c0_i32_0 = arith.constant 0 : i32
    %c0_i32_1 = arith.constant 0 : i32
    return %c0_i32, %c0_i32_0 : i32, i32
  }
  func.func @transform_4(%arg0: i32) -> (i32, i32) {
    %c0_i32 = arith.constant 0 : i32
    %c0_i32_0 = arith.constant 0 : i32
    %c0_i32_1 = arith.constant 0 : i32
    return %c0_i32, %c0_i32_0 : i32, i32
  }
  func.func @transform_5(%arg0: i32) -> (i32, i32) {
    %c0_i32 = arith.constant 0 : i32
    %c0_i32_0 = arith.constant 0 : i32
    return %arg0, %c0_i32 : i32, i32
  }
}

</mosaic_0001>

<bundles_post_ra>
// kernel: tpu_custom_call.1
= control target key start
LH: loop header
LB: loop body
LE: loop exit
PB: predicated region body
PF: predicated region fallthrough
CT: control target
= control target key end

     0   :  { %10 = vsyncpa [#allocation3], 0  ;;  %s794_s0 = inlined_call_operand.hbm [shape: f32[8,32], index: 0, kind: input, shape index: {}]   ;;  %s795_s1 = inlined_call_operand.hbm [shape: bf16[32,256], index: 1, kind: input, shape index: {}]   ;;  %s796_s2 = inlined_call_operand.hbm [shape: f32[1,256], index: 2, kind: input, shape index: {}]   ;;  %s797_s3 = inlined_call_operand.hbm [shape: bf16[256,256], index: 3, kind: input, shape index: {}]   ;;  %s798_s4 = inlined_call_operand.vmem [shape: f32[1,256], index: 4, kind: input, shape index: {}]   ;;  %s799_s5 = inlined_call_operand.hbm [shape: f32[8,256], index: 5, kind: output, shape index: {}]  }
   0x1   :  { %11 = vsyncpa [#allocation6], 0 }
   0x2   :  { %12 = vsyncpa [#allocation9], 0  ;;  %s29_s20 = sshll.u32 %s795_s1, 4  ;;  %s30_s20 = int_to_ptr.hbm [resolvable:$true] %s29_s20 }
   0x3   :  { %13 = vsyncpa [#allocation4], 0  ;;  %s737_s21 = smov [#allocation5]   ;;  %s19_s25 = sshll.u32 %s794_s0, 4  ;;  %s20_s25 = int_to_ptr.hbm [resolvable:$true] %s19_s25 }
   0x4   :  { %s31_s22 = sshll.u32 %s737_s21, 4  ;;  %s738_s26 = smov 128   ;;  %s32_s22 = int_to_ptr.vmem [resolvable:$true] %s31_s22 }
   0x5   :  { %s739_s27 = smov 8   ;;  %s740_s28 = smov [#allocation2]  }
   0x6   :  { %37 = dma.hbm_to_vmem [thread:$0]  %s30_s20, 512, %s32_s22, [#allocation6], %s738_s26, %s738_s26, %s739_s27  }
   0x7   :  { %s21_s29 = sshll.u32 %s740_s28, 4  ;;  %s43_s7 = sshll.u32 %s796_s2, 4  ;;  %s22_s29 = int_to_ptr.vmem [resolvable:$true] %s21_s29  ;;  %s44_s7 = int_to_ptr.hbm [resolvable:$true] %s43_s7 }
   0x8   :  { %24 = dma.hbm_to_vmem [thread:$0]  %s20_s25, 128, %s22_s29, [#allocation3]  }
   0x9   :  { %s53_s9 = sshll.u32 %s797_s3, 4  ;;  %s741_s10 = smov [#allocation7]   ;;  %s54_s9 = int_to_ptr.hbm [resolvable:$true] %s53_s9 }
   0xa   :  { %s45_s11 = sshll.u32 %s741_s10, 4  ;;  %s742_s0 = smov [#allocation8]   ;;  %s46_s11 = int_to_ptr.vmem [resolvable:$true] %s45_s11 }
   0xb   :  { %48 = dma.hbm_to_vmem [thread:$0]  %s44_s7, 32, %s46_s11, [#allocation6]  }
   0xc   :  { %s55_s12 = sshll.u32 %s742_s0, 4  ;;  %s56_s12 = int_to_ptr.vmem [resolvable:$true] %s55_s12 }
   0xd   :  { %61 = dma.hbm_to_vmem [thread:$0]  %s54_s9, 4096, %s56_s12, [#allocation9], %s738_s26, %s738_s26, %s739_s27  }
   0xe   :  { %729 = dma.done.wait [#allocation3], 128  }
   0xf   :  { %730 = vsyncadd [#allocation3], 4294967168 }
  0x10   :  { %731 = dma.done.wait [#allocation6], 544  }
  0x11   :  { %732 = vsyncadd [#allocation6], 4294966752 }
  0x12   :  { %733 = dma.done.wait [#allocation9], 4096  }
  0x13   :  { %734 = vsyncadd [#allocation9], 4294963200  ;;  %v430_v0 = vld [vmem:[#allocation5 + $0x10] sm:$0xf]  ;;  %v569_v1 = vld [vmem:[#allocation5 + $0x14] sm:$0xf0] }
  0x14   :  { %v568_v2 = vld [vmem:[#allocation5 + $0x14] sm:$0xf]  ;;  %v431_v3 = vor.u32 %v569_v1, %v430_v0  ;;  %v432_v4 = vld [vmem:[#allocation5 + $0x18] sm:$0xf0]  ;;  %v422_v5 = vld [vmem:[#allocation5] sm:$0xf] }
  0x15   :  { %v567_v6 = vld [vmem:[#allocation5 + $0x4] sm:$0xf0]  ;;  %v435_v7 = vor.u32 %v568_v2, %v432_v4  ;;  %v566_v8 = vld [vmem:[#allocation5 + $0x4] sm:$0xf]  ;;  %v424_v9 = vld [vmem:[#allocation5 + $0x8] sm:$0xf0] }
  0x16   :  { %v81_v10 = vld [vmem:[#allocation2] sm:$0xff]  ;;  %vm113_vm0 = vcmask 261120   ;;  %123 = vmatpush.bf16.msra.mxu0 %v431_v3  ;;  %v423_v11 = vor.u32 %v567_v6, %v422_v5  ;;  %v496_v12 = vld [vmem:[#allocation8 + $0x70] sm:$0xf]  ;;  %v427_v15 = vor.u32 %v566_v8, %v424_v9  ;;  %v488_v24 = vld [vmem:[#allocation8 + $0x60] sm:$0xf] }
  0x17   :  { %v585_v13 = vld [vmem:[#allocation8 + $0x74] sm:$0xf0]  ;;  %v560_v14 = vld [vmem:[#allocation8 + $0xf0] sm:$0xf]  ;;  %136 = vmatpush.bf16.msra.mxu1 %v435_v7  ;;  %v584_v18 = vld [vmem:[#allocation8 + $0x74] sm:$0xf]  ;;  %v82_v25 = vpack.c.bf16 %v81_v10, %v81_v10 }
  0x18   :  { %v497_v16 = vor.u32 %v585_v13, %v496_v12  ;;  %v601_v17 = vld [vmem:[#allocation8 + $0xf4] sm:$0xf0]  ;;  %v498_v19 = vld [vmem:[#allocation8 + $0x78] sm:$0xf0]  ;;  %v600_v22 = vld [vmem:[#allocation8 + $0xf4] sm:$0xf] }
  0x19   :  { %v561_v20 = vor.u32 %v601_v17, %v560_v14  ;;  %v501_v21 = vor.u32 %v584_v18, %v498_v19  ;;  %v562_v23 = vld [vmem:[#allocation8 + $0xf8] sm:$0xf0]  ;;  %v583_v27 = vld [vmem:[#allocation8 + $0x64] sm:$0xf0]  ;;  %v552_v28 = vld [vmem:[#allocation8 + $0xe0] sm:$0xf] }
  0x1a   :  { %345 = vmatpush.bf16.msra.mxu2 %v497_v16  ;;  %v565_v26 = vor.u32 %v600_v22, %v562_v23  ;;  %v599_v29 = vld [vmem:[#allocation8 + $0xe4] sm:$0xf0]  ;;  %124 = vmatpush.bf16.msra.mxu0 %v423_v11  ;;  %v489_v30 = vor.u32 %v583_v27, %v488_v24  ;;  %v582_v32 = vld [vmem:[#allocation8 + $0x64] sm:$0xf]  ;;  %v490_v33 = vld [vmem:[#allocation8 + $0x68] sm:$0xf0] }
  0x1b   :  { %358 = vmatpush.bf16.msra.mxu3 %v561_v20  ;;  %v553_v31 = vor.u32 %v599_v29, %v552_v28  ;;  %v598_v34 = vld [vmem:[#allocation8 + $0xe4] sm:$0xf]  ;;  %137 = vmatpush.bf16.msra.mxu1 %v427_v15  ;;  %v493_v35 = vor.u32 %v582_v32, %v490_v33  ;;  %v554_v36 = vld [vmem:[#allocation8 + $0xe8] sm:$0xf0]  ;;  %v480_v37 = vld [vmem:[#allocation8 + $0x50] sm:$0xf] }
  0x1c   :  { %v581_v38 = vld [vmem:[#allocation8 + $0x54] sm:$0xf0]  ;;  %v557_v39 = vor.u32 %v598_v34, %v554_v36  ;;  %v544_v40 = vld [vmem:[#allocation8 + $0xd0] sm:$0xf]  ;;  %v580_v42 = vld [vmem:[#allocation8 + $0x54] sm:$0xf] }
  0x1d   :  { %v597_v41 = vld [vmem:[#allocation8 + $0xd4] sm:$0xf0]  ;;  %436 = vmatmul.msk.bf16.vlgmr.msra.gmra.mxu0 %vm113_vm0, %v82_v25  ;;  %v481_v43 = vor.u32 %v581_v38, %v480_v37  ;;  %v482_v44 = vld [vmem:[#allocation8 + $0x58] sm:$0xf0]  ;;  %v596_v45 = vld [vmem:[#allocation8 + $0xd4] sm:$0xf] }
  0x1e   :  { %371 = vmatpush.bf16.msrb.mxu0 %v501_v21  ;;  %346 = vmatpush.bf16.msra.mxu2 %v489_v30  ;;  %v546_v46 = vld [vmem:[#allocation8 + $0xd8] sm:$0xf0]  ;;  %v545_v47 = vor.u32 %v597_v41, %v544_v40  ;;  %v472_v48 = vld [vmem:[#allocation8 + $0x40] sm:$0xf]  ;;  %v579_v49 = vld [vmem:[#allocation8 + $0x44] sm:$0xf0]  ;;  %v485_v50 = vor.u32 %v580_v42, %v482_v44 }
  0x1f   :  { %384 = vmatpush.bf16.msrb.mxu1 %v565_v26  ;;  %359 = vmatpush.bf16.msra.mxu3 %v553_v31  ;;  %v536_v51 = vld [vmem:[#allocation8 + $0xc0] sm:$0xf]  ;;  %v595_v52 = vld [vmem:[#allocation8 + $0xc4] sm:$0xf0]  ;;  %v549_v53 = vor.u32 %v596_v45, %v546_v46  ;;  %v578_v54 = vld [vmem:[#allocation8 + $0x44] sm:$0xf]  ;;  %v473_v56 = vor.u32 %v579_v49, %v472_v48 }
  0x20   :  { %437 = vmatmul.msk.bf16.vlgmr.msra.gmra.mxu1 %vm113_vm0, %v82_v25  ;;  %v474_v55 = vld [vmem:[#allocation8 + $0x48] sm:$0xf0]  ;;  %v594_v57 = vld [vmem:[#allocation8 + $0xc4] sm:$0xf]  ;;  %v537_v59 = vor.u32 %v595_v52, %v536_v51  ;;  %v464_v60 = vld [vmem:[#allocation8 + $0x30] sm:$0xf] }
  0x21   :  { %v538_v58 = vld [vmem:[#allocation8 + $0xc8] sm:$0xf0]  ;;  %v577_v61 = vld [vmem:[#allocation8 + $0x34] sm:$0xf0]  ;;  %v477_v62 = vor.u32 %v578_v54, %v474_v55  ;;  %v528_v63 = vld [vmem:[#allocation8 + $0xb0] sm:$0xf] }
  0x22   :  { %372 = vmatpush.bf16.msrb.mxu0 %v493_v35  ;;  %347 = vmatpush.bf16.msra.mxu2 %v481_v43  ;;  %v593_v0 = vld [vmem:[#allocation8 + $0xb4] sm:$0xf0]  ;;  %v541_v1 = vor.u32 %v594_v57, %v538_v58  ;;  %v576_v2 = vld [vmem:[#allocation8 + $0x34] sm:$0xf]  ;;  %v466_v3 = vld [vmem:[#allocation8 + $0x38] sm:$0xf0]  ;;  %v465_v4 = vor.u32 %v577_v61, %v464_v60 }
  0x23   :  { %385 = vmatpush.bf16.msrb.mxu1 %v557_v39  ;;  %360 = vmatpush.bf16.msra.mxu3 %v545_v47  ;;  %v592_v5 = vld [vmem:[#allocation8 + $0xb4] sm:$0xf]  ;;  %v530_v6 = vld [vmem:[#allocation8 + $0xb8] sm:$0xf0]  ;;  %v529_v7 = vor.u32 %v593_v0, %v528_v63  ;;  %v456_v8 = vld [vmem:[#allocation8 + $0x20] sm:$0xf]  ;;  %v469_v10 = vor.u32 %v576_v2, %v466_v3 }
  0x24   :  { %v575_v9 = vld [vmem:[#allocation8 + $0x24] sm:$0xf0]  ;;  %v520_v11 = vld [vmem:[#allocation8 + $0xa0] sm:$0xf]  ;;  %v533_v13 = vor.u32 %v592_v5, %v530_v6  ;;  %v574_v14 = vld [vmem:[#allocation8 + $0x24] sm:$0xf] }
  0x25   :  { %v591_v12 = vld [vmem:[#allocation8 + $0xa4] sm:$0xf0]  ;;  %v458_v15 = vld [vmem:[#allocation8 + $0x28] sm:$0xf0]  ;;  %v457_v16 = vor.u32 %v575_v9, %v456_v8  ;;  %v590_v17 = vld [vmem:[#allocation8 + $0xa4] sm:$0xf] }
  0x26   :  { %373 = vmatpush.bf16.msrb.mxu0 %v485_v50  ;;  %348 = vmatpush.bf16.msra.mxu2 %v473_v56  ;;  %v522_v18 = vld [vmem:[#allocation8 + $0xa8] sm:$0xf0]  ;;  %v521_v19 = vor.u32 %v591_v12, %v520_v11  ;;  %v461_v20 = vor.u32 %v574_v14, %v458_v15  ;;  %v448_v22 = vld [vmem:[#allocation8 + $0x10] sm:$0xf]  ;;  %v573_v23 = vld [vmem:[#allocation8 + $0x14] sm:$0xf0] }
  0x27   :  { %386 = vmatpush.bf16.msrb.mxu1 %v549_v53  ;;  %361 = vmatpush.bf16.msra.mxu3 %v537_v59  ;;  %v525_v21 = vor.u32 %v590_v17, %v522_v18  ;;  %v512_v24 = vld [vmem:[#allocation8 + $0x90] sm:$0xf]  ;;  %v449_v25 = vor.u32 %v573_v23, %v448_v22  ;;  %v589_v26 = vld [vmem:[#allocation8 + $0x94] sm:$0xf0]  ;;  %v572_v27 = vld [vmem:[#allocation8 + $0x14] sm:$0xf] }
  0x28   :  { %v450_v28 = vld [vmem:[#allocation8 + $0x18] sm:$0xf0]  ;;  %v513_v29 = vor.u32 %v589_v26, %v512_v24  ;;  %v588_v31 = vld [vmem:[#allocation8 + $0x94] sm:$0xf]  ;;  %v440_v34 = vld [vmem:[#allocation8] sm:$0xf] }
  0x29   :  { %v453_v30 = vor.u32 %v572_v27, %v450_v28  ;;  %v514_v32 = vld [vmem:[#allocation8 + $0x98] sm:$0xf0]  ;;  %v571_v35 = vld [vmem:[#allocation8 + $0x4] sm:$0xf0]  ;;  %v504_v36 = vld [vmem:[#allocation8 + $0x80] sm:$0xf] }
  0x2a   :  { %374 = vmatpush.bf16.msrb.mxu0 %v477_v62  ;;  %349 = vmatpush.bf16.msra.mxu2 %v465_v4  ;;  %v517_v33 = vor.u32 %v588_v31, %v514_v32  ;;  %v441_v37 = vor.u32 %v571_v35, %v440_v34  ;;  %v587_v38 = vld [vmem:[#allocation8 + $0x84] sm:$0xf0]  ;;  %v570_v39 = vld [vmem:[#allocation8 + $0x4] sm:$0xf]  ;;  %v442_v40 = vld [vmem:[#allocation8 + $0x8] sm:$0xf0] }
  0x2b   :  { %387 = vmatpush.bf16.msrb.mxu1 %v541_v1  ;;  %362 = vmatpush.bf16.msra.mxu3 %v529_v7  ;;  %v505_v41 = vor.u32 %v587_v38, %v504_v36  ;;  %v445_v42 = vor.u32 %v570_v39, %v442_v40  ;;  %v586_v43 = vld [vmem:[#allocation8 + $0x84] sm:$0xf]  ;;  %v506_v44 = vld [vmem:[#allocation8 + $0x88] sm:$0xf0]  ;;  %v87_v46 = vld [vmem:[#allocation7] sm:$0x3] }
  0x2c   :  { %v509_v45 = vor.u32 %v586_v43, %v506_v44  ;;  %v89_v47 = vperm.slane %v87_v46, 0  ;;  %v90_v48 = vperm.slane %v87_v46, 1  ;;  %v179_v59 = vld [vmem:[%s798_s4] sm:$0x3]  ;;  %s743_s13 = smov [#allocation10]   ;;  %s408_s17 = sshll.u32 %s799_s5, 4  ;;  %s409_s17 = int_to_ptr.hbm [resolvable:$true] %s408_s17 }
  0x2d   :  { %v182_v60 = vperm.slane %v179_v59, 1  ;;  %v181_v1 = vperm.slane %v179_v59, 0  ;;  %s406_s14 = sshll.u32 %s743_s13, 4  ;;  %s407_s14 = int_to_ptr.vmem [resolvable:$true] %s406_s14 }
  0x2e   :  { %375 = vmatpush.bf16.msrb.mxu0 %v469_v10  ;;  %350 = vmatpush.bf16.msra.mxu2 %v457_v16 }
  0x2f   :  { %388 = vmatpush.bf16.msrb.mxu1 %v533_v13  ;;  %363 = vmatpush.bf16.msra.mxu3 %v521_v19 }
  0x32   :  { %376 = vmatpush.bf16.msrb.mxu0 %v461_v20  ;;  %351 = vmatpush.bf16.msra.mxu2 %v449_v25 }
  0x33   :  { %389 = vmatpush.bf16.msrb.mxu1 %v525_v21  ;;  %364 = vmatpush.bf16.msra.mxu3 %v513_v29 }
  0x36   :  { %377 = vmatpush.bf16.msrb.mxu0 %v453_v30  ;;  %352 = vmatpush.bf16.msra.mxu2 %v441_v37 }
  0x37   :  { %390 = vmatpush.bf16.msrb.mxu1 %v517_v33  ;;  %365 = vmatpush.bf16.msra.mxu3 %v505_v41 }
  0x3a   :  { %378 = vmatpush.bf16.msrb.mxu0 %v445_v42 }
  0x3b   :  { %391 = vmatpush.bf16.msrb.mxu1 %v509_v45 }
  0x9a   :  { %v126_v49 = vpop.f32.mrf.mxu0 }
  0x9b   :  { %v127_v50 = vadd.f32 %v126_v49, %v89_v47 }
  0x9d   :  { %v139_v51 = vpop.f32.mrf.mxu1  ;;  %v143_v53 = vmax.f32 %v127_v50, 0.0 }
  0x9e   :  { %v140_v52 = vadd.f32 %v139_v51, %v90_v48 }
  0x9f   :  { %v145_v55 = vpack.c.bf16 %v143_v53, %v143_v53 }
  0xa0   :  { %v144_v54 = vmax.f32 %v140_v52, 0.0 }
  0xa1   :  { %353 = vmatmul.bf16.vlgmr.msra.gmra.mxu2 %v145_v55  ;;  %379 = vmatmul.bf16.vlgmr.msrb.gmra.mxu0 %v145_v55 }
  0xa2   :  { %v146_v56 = vpack.c.bf16 %v144_v54, %v144_v54  ;;  %v128_v57 = vpop.f32.mrf.mxu0 }
  0xa4   :  { %366 = vmatmul.bf16.vlgmr.msra.gmra.mxu3 %v146_v56  ;;  %392 = vmatmul.bf16.vlgmr.msrb.gmra.mxu1 %v146_v56 }
  0xa5   :  { %v141_v58 = vpop.f32.mrf.mxu1 }
 0x11e   :  { %v380_v61 = vpop.f32.mrf.mxu0 }
 0x11f   :  { %v381_v62 = vadd.f32 %v380_v61, %v182_v60 }
 0x121   :  { %v393_v63 = vpop.f32.mrf.mxu1 }
 0x122   :  { %v394_v0 = vadd.f32 %v393_v63, %v381_v62 }
 0x124   :  { %v398_v2 = vmax.f32 %v394_v0, 0.0  ;;  %v354_v3 = vpop.f32.mrf.mxu2 }
 0x125   :  { %v355_v4 = vadd.f32 %v354_v3, %v181_v1 }
 0x126   :  { %400 = vst [vmem:[#allocation10 + $0x8] sm:$0xff] %v398_v2  ;;  %v382_v6 = vpop.f32.mrf.mxu0 }
 0x127   :  { %v367_v5 = vpop.f32.mrf.mxu3 }
 0x128   :  { %v368_v7 = vadd.f32 %v367_v5, %v355_v4 }
 0x129   :  { %v395_v8 = vpop.f32.mrf.mxu1 }
 0x12a   :  { %v397_v9 = vmax.f32 %v368_v7, 0.0 }
 0x12c   :  { %399 = vst [vmem:[#allocation10] sm:$0xff] %v397_v9  ;;  %v356_v10 = vpop.f32.mrf.mxu2 }
 0x12d   :  { %411 = dma.vmem_to_hbm [thread:$0]  %s407_s14, 256, %s409_s17, [#allocation4]  }
 0x12f   :  { %v369_v11 = vpop.f32.mrf.mxu3 }
 0x130   :  { %735 = dma.done.wait [#allocation4], 256  }
 0x131   :  { %736 = vsyncadd [#allocation4], 4294967040 }
 0x132   :  { %416 = vsyncpa [#allocation3], 1 }
 0x133   :  { %417 = vsyncpa [#allocation6], 1 }
 0x134   :  { %418 = vsyncpa [#allocation9], 1 }
 0x135   :  { %419 = vsyncpa [#allocation4], 1 }

// kernel: tpu_custom_call.1
= control target key start
LH: loop header
LB: loop body
LE: loop exit
PB: predicated region body
PF: predicated region fallthrough
CT: control target
= control target key end

     0   :  { %10 = vsyncpa [#allocation3], 0  ;;  %s794_s0 = inlined_call_operand.hbm [shape: f32[8,32], index: 0, kind: input, shape index: {}]   ;;  %s795_s1 = inlined_call_operand.hbm [shape: bf16[32,256], index: 1, kind: input, shape index: {}]   ;;  %s796_s2 = inlined_call_operand.hbm [shape: f32[1,256], index: 2, kind: input, shape index: {}]   ;;  %s797_s3 = inlined_call_operand.hbm [shape: bf16[256,256], index: 3, kind: input, shape index: {}]   ;;  %s798_s4 = inlined_call_operand.vmem [shape: f32[1,256], index: 4, kind: input, shape index: {}]   ;;  %s799_s5 = inlined_call_operand.hbm [shape: f32[8,256], index: 5, kind: output, shape index: {}]  }
   0x1   :  { %11 = vsyncpa [#allocation6], 0 }
   0x2   :  { %12 = vsyncpa [#allocation9], 0  ;;  %s29_s20 = sshll.u32 %s795_s1, 4  ;;  %s30_s20 = int_to_ptr.hbm [resolvable:$true] %s29_s20 }
   0x3   :  { %13 = vsyncpa [#allocation4], 0  ;;  %s737_s21 = smov [#allocation5]   ;;  %s19_s25 = sshll.u32 %s794_s0, 4  ;;  %s20_s25 = int_to_ptr.hbm [resolvable:$true] %s19_s25 }
   0x4   :  { %s31_s22 = sshll.u32 %s737_s21, 4  ;;  %s738_s26 = smov 128   ;;  %s32_s22 = int_to_ptr.vmem [resolvable:$true] %s31_s22 }
   0x5   :  { %s739_s27 = smov 8   ;;  %s740_s28 = smov [#allocation2]  }
   0x6   :  { %37 = dma.hbm_to_vmem [thread:$0]  %s30_s20, 512, %s32_s22, [#allocation6], %s738_s26, %s738_s26, %s739_s27  }
   0x7   :  { %s21_s29 = sshll.u32 %s740_s28, 4  ;;  %s43_s7 = sshll.u32 %s796_s2, 4  ;;  %s22_s29 = int_to_ptr.vmem [resolvable:$true] %s21_s29  ;;  %s44_s7 = int_to_ptr.hbm [resolvable:$true] %s43_s7 }
   0x8   :  { %24 = dma.hbm_to_vmem [thread:$0]  %s20_s25, 128, %s22_s29, [#allocation3]  }
   0x9   :  { %s53_s9 = sshll.u32 %s797_s3, 4  ;;  %s741_s10 = smov [#allocation7]   ;;  %s54_s9 = int_to_ptr.hbm [resolvable:$true] %s53_s9 }
   0xa   :  { %s45_s11 = sshll.u32 %s741_s10, 4  ;;  %s742_s0 = smov [#allocation8]   ;;  %s46_s11 = int_to_ptr.vmem [resolvable:$true] %s45_s11 }
   0xb   :  { %48 = dma.hbm_to_vmem [thread:$0]  %s44_s7, 32, %s46_s11, [#allocation6]  }
   0xc   :  { %s55_s12 = sshll.u32 %s742_s0, 4  ;;  %s56_s12 = int_to_ptr.vmem [resolvable:$true] %s55_s12 }
   0xd   :  { %61 = dma.hbm_to_vmem [thread:$0]  %s54_s9, 4096, %s56_s12, [#allocation9], %s738_s26, %s738_s26, %s739_s27  }
   0xe   :  { %729 = dma.done.wait [#allocation3], 128  }
   0xf   :  { %730 = vsyncadd [#allocation3], 4294967168 }
  0x10   :  { %731 = dma.done.wait [#allocation6], 544  }
  0x11   :  { %732 = vsyncadd [#allocation6], 4294966752 }
  0x12   :  { %733 = dma.done.wait [#allocation9], 4096  }
  0x13   :  { %734 = vsyncadd [#allocation9], 4294963200  ;;  %v430_v0 = vld [vmem:[#allocation5 + $0x10] sm:$0xf]  ;;  %v569_v1 = vld [vmem:[#allocation5 + $0x14] sm:$0xf0] }
  0x14   :  { %v568_v2 = vld [vmem:[#allocation5 + $0x14] sm:$0xf]  ;;  %v431_v3 = vor.u32 %v569_v1, %v430_v0  ;;  %v432_v4 = vld [vmem:[#allocation5 + $0x18] sm:$0xf0]  ;;  %v422_v5 = vld [vmem:[#allocation5] sm:$0xf] }
  0x15   :  { %v567_v6 = vld [vmem:[#allocation5 + $0x4] sm:$0xf0]  ;;  %v435_v7 = vor.u32 %v568_v2, %v432_v4  ;;  %v566_v8 = vld [vmem:[#allocation5 + $0x4] sm:$0xf]  ;;  %v424_v9 = vld [vmem:[#allocation5 + $0x8] sm:$0xf0] }
  0x16   :  { %v81_v10 = vld [vmem:[#allocation2] sm:$0xff]  ;;  %vm113_vm0 = vcmask 261120   ;;  %123 = vmatpush.bf16.msra.mxu0 %v431_v3  ;;  %v423_v11 = vor.u32 %v567_v6, %v422_v5  ;;  %v496_v12 = vld [vmem:[#allocation8 + $0x70] sm:$0xf]  ;;  %v427_v15 = vor.u32 %v566_v8, %v424_v9  ;;  %v488_v24 = vld [vmem:[#allocation8 + $0x60] sm:$0xf] }
  0x17   :  { %v585_v13 = vld [vmem:[#allocation8 + $0x74] sm:$0xf0]  ;;  %v560_v14 = vld [vmem:[#allocation8 + $0xf0] sm:$0xf]  ;;  %136 = vmatpush.bf16.msra.mxu1 %v435_v7  ;;  %v584_v18 = vld [vmem:[#allocation8 + $0x74] sm:$0xf]  ;;  %v82_v25 = vpack.c.bf16 %v81_v10, %v81_v10 }
  0x18   :  { %v497_v16 = vor.u32 %v585_v13, %v496_v12  ;;  %v601_v17 = vld [vmem:[#allocation8 + $0xf4] sm:$0xf0]  ;;  %v498_v19 = vld [vmem:[#allocation8 + $0x78] sm:$0xf0]  ;;  %v600_v22 = vld [vmem:[#allocation8 + $0xf4] sm:$0xf] }
  0x19   :  { %v561_v20 = vor.u32 %v601_v17, %v560_v14  ;;  %v501_v21 = vor.u32 %v584_v18, %v498_v19  ;;  %v562_v23 = vld [vmem:[#allocation8 + $0xf8] sm:$0xf0]  ;;  %v583_v27 = vld [vmem:[#allocation8 + $0x64] sm:$0xf0]  ;;  %v552_v28 = vld [vmem:[#allocation8 + $0xe0] sm:$0xf] }
  0x1a   :  { %345 = vmatpush.bf16.msra.mxu2 %v497_v16  ;;  %v565_v26 = vor.u32 %v600_v22, %v562_v23  ;;  %v599_v29 = vld [vmem:[#allocation8 + $0xe4] sm:$0xf0]  ;;  %124 = vmatpush.bf16.msra.mxu0 %v423_v11  ;;  %v489_v30 = vor.u32 %v583_v27, %v488_v24  ;;  %v582_v32 = vld [vmem:[#allocation8 + $0x64] sm:$0xf]  ;;  %v490_v33 = vld [vmem:[#allocation8 + $0x68] sm:$0xf0] }
  0x1b   :  { %358 = vmatpush.bf16.msra.mxu3 %v561_v20  ;;  %v553_v31 = vor.u32 %v599_v29, %v552_v28  ;;  %v598_v34 = vld [vmem:[#allocation8 + $0xe4] sm:$0xf]  ;;  %137 = vmatpush.bf16.msra.mxu1 %v427_v15  ;;  %v493_v35 = vor.u32 %v582_v32, %v490_v33  ;;  %v554_v36 = vld [vmem:[#allocation8 + $0xe8] sm:$0xf0]  ;;  %v480_v37 = vld [vmem:[#allocation8 + $0x50] sm:$0xf] }
  0x1c   :  { %v581_v38 = vld [vmem:[#allocation8 + $0x54] sm:$0xf0]  ;;  %v557_v39 = vor.u32 %v598_v34, %v554_v36  ;;  %v544_v40 = vld [vmem:[#allocation8 + $0xd0] sm:$0xf]  ;;  %v580_v42 = vld [vmem:[#allocation8 + $0x54] sm:$0xf] }
  0x1d   :  { %v597_v41 = vld [vmem:[#allocation8 + $0xd4] sm:$0xf0]  ;;  %436 = vmatmul.msk.bf16.vlgmr.msra.gmra.mxu0 %vm113_vm0, %v82_v25  ;;  %v481_v43 = vor.u32 %v581_v38, %v480_v37  ;;  %v482_v44 = vld [vmem:[#allocation8 + $0x58] sm:$0xf0]  ;;  %v596_v45 = vld [vmem:[#allocation8 + $0xd4] sm:$0xf] }
  0x1e   :  { %371 = vmatpush.bf16.msrb.mxu0 %v501_v21  ;;  %346 = vmatpush.bf16.msra.mxu2 %v489_v30  ;;  %v546_v46 = vld [vmem:[#allocation8 + $0xd8] sm:$0xf0]  ;;  %v545_v47 = vor.u32 %v597_v41, %v544_v40  ;;  %v472_v48 = vld [vmem:[#allocation8 + $0x40] sm:$0xf]  ;;  %v579_v49 = vld [vmem:[#allocation8 + $0x44] sm:$0xf0]  ;;  %v485_v50 = vor.u32 %v580_v42, %v482_v44 }
  0x1f   :  { %384 = vmatpush.bf16.msrb.mxu1 %v565_v26  ;;  %359 = vmatpush.bf16.msra.mxu3 %v553_v31  ;;  %v536_v51 = vld [vmem:[#allocation8 + $0xc0] sm:$0xf]  ;;  %v595_v52 = vld [vmem:[#allocation8 + $0xc4] sm:$0xf0]  ;;  %v549_v53 = vor.u32 %v596_v45, %v546_v46  ;;  %v578_v54 = vld [vmem:[#allocation8 + $0x44] sm:$0xf]  ;;  %v473_v56 = vor.u32 %v579_v49, %v472_v48 }
  0x20   :  { %437 = vmatmul.msk.bf16.vlgmr.msra.gmra.mxu1 %vm113_vm0, %v82_v25  ;;  %v474_v55 = vld [vmem:[#allocation8 + $0x48] sm:$0xf0]  ;;  %v594_v57 = vld [vmem:[#allocation8 + $0xc4] sm:$0xf]  ;;  %v537_v59 = vor.u32 %v595_v52, %v536_v51  ;;  %v464_v60 = vld [vmem:[#allocation8 + $0x30] sm:$0xf] }
  0x21   :  { %v538_v58 = vld [vmem:[#allocation8 + $0xc8] sm:$0xf0]  ;;  %v577_v61 = vld [vmem:[#allocation8 + $0x34] sm:$0xf0]  ;;  %v477_v62 = vor.u32 %v578_v54, %v474_v55  ;;  %v528_v63 = vld [vmem:[#allocation8 + $0xb0] sm:$0xf] }
  0x22   :  { %372 = vmatpush.bf16.msrb.mxu0 %v493_v35  ;;  %347 = vmatpush.bf16.msra.mxu2 %v481_v43  ;;  %v593_v0 = vld [vmem:[#allocation8 + $0xb4] sm:$0xf0]  ;;  %v541_v1 = vor.u32 %v594_v57, %v538_v58  ;;  %v576_v2 = vld [vmem:[#allocation8 + $0x34] sm:$0xf]  ;;  %v466_v3 = vld [vmem:[#allocation8 + $0x38] sm:$0xf0]  ;;  %v465_v4 = vor.u32 %v577_v61, %v464_v60 }
  0x23   :  { %385 = vmatpush.bf16.msrb.mxu1 %v557_v39  ;;  %360 = vmatpush.bf16.msra.mxu3 %v545_v47  ;;  %v592_v5 = vld [vmem:[#allocation8 + $0xb4] sm:$0xf]  ;;  %v530_v6 = vld [vmem:[#allocation8 + $0xb8] sm:$0xf0]  ;;  %v529_v7 = vor.u32 %v593_v0, %v528_v63  ;;  %v456_v8 = vld [vmem:[#allocation8 + $0x20] sm:$0xf]  ;;  %v469_v10 = vor.u32 %v576_v2, %v466_v3 }
  0x24   :  { %v575_v9 = vld [vmem:[#allocation8 + $0x24] sm:$0xf0]  ;;  %v520_v11 = vld [vmem:[#allocation8 + $0xa0] sm:$0xf]  ;;  %v533_v13 = vor.u32 %v592_v5, %v530_v6  ;;  %v574_v14 = vld [vmem:[#allocation8 + $0x24] sm:$0xf] }
  0x25   :  { %v591_v12 = vld [vmem:[#allocation8 + $0xa4] sm:$0xf0]  ;;  %v458_v15 = vld [vmem:[#allocation8 + $0x28] sm:$0xf0]  ;;  %v457_v16 = vor.u32 %v575_v9, %v456_v8  ;;  %v590_v17 = vld [vmem:[#allocation8 + $0xa4] sm:$0xf] }
  0x26   :  { %373 = vmatpush.bf16.msrb.mxu0 %v485_v50  ;;  %348 = vmatpush.bf16.msra.mxu2 %v473_v56  ;;  %v522_v18 = vld [vmem:[#allocation8 + $0xa8] sm:$0xf0]  ;;  %v521_v19 = vor.u32 %v591_v12, %v520_v11  ;;  %v461_v20 = vor.u32 %v574_v14, %v458_v15  ;;  %v448_v22 = vld [vmem:[#allocation8 + $0x10] sm:$0xf]  ;;  %v573_v23 = vld [vmem:[#allocation8 + $0x14] sm:$0xf0] }
  0x27   :  { %386 = vmatpush.bf16.msrb.mxu1 %v549_v53  ;;  %361 = vmatpush.bf16.msra.mxu3 %v537_v59  ;;  %v525_v21 = vor.u32 %v590_v17, %v522_v18  ;;  %v512_v24 = vld [vmem:[#allocation8 + $0x90] sm:$0xf]  ;;  %v449_v25 = vor.u32 %v573_v23, %v448_v22  ;;  %v589_v26 = vld [vmem:[#allocation8 + $0x94] sm:$0xf0]  ;;  %v572_v27 = vld [vmem:[#allocation8 + $0x14] sm:$0xf] }
  0x28   :  { %v450_v28 = vld [vmem:[#allocation8 + $0x18] sm:$0xf0]  ;;  %v513_v29 = vor.u32 %v589_v26, %v512_v24  ;;  %v588_v31 = vld [vmem:[#allocation8 + $0x94] sm:$0xf]  ;;  %v440_v34 = vld [vmem:[#allocation8] sm:$0xf] }
  0x29   :  { %v453_v30 = vor.u32 %v572_v27, %v450_v28  ;;  %v514_v32 = vld [vmem:[#allocation8 + $0x98] sm:$0xf0]  ;;  %v571_v35 = vld [vmem:[#allocation8 + $0x4] sm:$0xf0]  ;;  %v504_v36 = vld [vmem:[#allocation8 + $0x80] sm:$0xf] }
  0x2a   :  { %374 = vmatpush.bf16.msrb.mxu0 %v477_v62  ;;  %349 = vmatpush.bf16.msra.mxu2 %v465_v4  ;;  %v517_v33 = vor.u32 %v588_v31, %v514_v32  ;;  %v441_v37 = vor.u32 %v571_v35, %v440_v34  ;;  %v587_v38 = vld [vmem:[#allocation8 + $0x84] sm:$0xf0]  ;;  %v570_v39 = vld [vmem:[#allocation8 + $0x4] sm:$0xf]  ;;  %v442_v40 = vld [vmem:[#allocation8 + $0x8] sm:$0xf0] }
  0x2b   :  { %387 = vmatpush.bf16.msrb.mxu1 %v541_v1  ;;  %362 = vmatpush.bf16.msra.mxu3 %v529_v7  ;;  %v505_v41 = vor.u32 %v587_v38, %v504_v36  ;;  %v445_v42 = vor.u32 %v570_v39, %v442_v40  ;;  %v586_v43 = vld [vmem:[#allocation8 + $0x84] sm:$0xf]  ;;  %v506_v44 = vld [vmem:[#allocation8 + $0x88] sm:$0xf0]  ;;  %v87_v46 = vld [vmem:[#allocation7] sm:$0x3] }
  0x2c   :  { %v509_v45 = vor.u32 %v586_v43, %v506_v44  ;;  %v89_v47 = vperm.slane %v87_v46, 0  ;;  %v90_v48 = vperm.slane %v87_v46, 1  ;;  %v179_v59 = vld [vmem:[%s798_s4] sm:$0x3]  ;;  %s743_s13 = smov [#allocation10]   ;;  %s408_s17 = sshll.u32 %s799_s5, 4  ;;  %s409_s17 = int_to_ptr.hbm [resolvable:$true] %s408_s17 }
  0x2d   :  { %v182_v60 = vperm.slane %v179_v59, 1  ;;  %v181_v1 = vperm.slane %v179_v59, 0  ;;  %s406_s14 = sshll.u32 %s743_s13, 4  ;;  %s407_s14 = int_to_ptr.vmem [resolvable:$true] %s406_s14 }
  0x2e   :  { %375 = vmatpush.bf16.msrb.mxu0 %v469_v10  ;;  %350 = vmatpush.bf16.msra.mxu2 %v457_v16 }
  0x2f   :  { %388 = vmatpush.bf16.msrb.mxu1 %v533_v13  ;;  %363 = vmatpush.bf16.msra.mxu3 %v521_v19 }
  0x32   :  { %376 = vmatpush.bf16.msrb.mxu0 %v461_v20  ;;  %351 = vmatpush.bf16.msra.mxu2 %v449_v25 }
  0x33   :  { %389 = vmatpush.bf16.msrb.mxu1 %v525_v21  ;;  %364 = vmatpush.bf16.msra.mxu3 %v513_v29 }
  0x36   :  { %377 = vmatpush.bf16.msrb.mxu0 %v453_v30  ;;  %352 = vmatpush.bf16.msra.mxu2 %v441_v37 }
  0x37   :  { %390 = vmatpush.bf16.msrb.mxu1 %v517_v33  ;;  %365 = vmatpush.bf16.msra.mxu3 %v505_v41 }
  0x3a   :  { %378 = vmatpush.bf16.msrb.mxu0 %v445_v42 }
  0x3b   :  { %391 = vmatpush.bf16.msrb.mxu1 %v509_v45 }
  0x9a   :  { %v126_v49 = vpop.f32.mrf.mxu0 }
  0x9b   :  { %v127_v50 = vadd.f32 %v126_v49, %v89_v47 }
  0x9d   :  { %v139_v51 = vpop.f32.mrf.mxu1  ;;  %v143_v53 = vmax.f32 %v127_v50, 0.0 }
  0x9e   :  { %v140_v52 = vadd.f32 %v139_v51, %v90_v48 }
  0x9f   :  { %v145_v55 = vpack.c.bf16 %v143_v53, %v143_v53 }
  0xa0   :  { %v144_v54 = vmax.f32 %v140_v52, 0.0 }
  0xa1   :  { %353 = vmatmul.bf16.vlgmr.msra.gmra.mxu2 %v145_v55  ;;  %379 = vmatmul.bf16.vlgmr.msrb.gmra.mxu0 %v145_v55 }
  0xa2   :  { %v146_v56 = vpack.c.bf16 %v144_v54, %v144_v54  ;;  %v128_v57 = vpop.f32.mrf.mxu0 }
  0xa4   :  { %366 = vmatmul.bf16.vlgmr.msra.gmra.mxu3 %v146_v56  ;;  %392 = vmatmul.bf16.vlgmr.msrb.gmra.mxu1 %v146_v56 }
  0xa5   :  { %v141_v58 = vpop.f32.mrf.mxu1 }
 0x11e   :  { %v380_v61 = vpop.f32.mrf.mxu0 }
 0x11f   :  { %v381_v62 = vadd.f32 %v380_v61, %v182_v60 }
 0x121   :  { %v393_v63 = vpop.f32.mrf.mxu1 }
 0x122   :  { %v394_v0 = vadd.f32 %v393_v63, %v381_v62 }
 0x124   :  { %v398_v2 = vmax.f32 %v394_v0, 0.0  ;;  %v354_v3 = vpop.f32.mrf.mxu2 }
 0x125   :  { %v355_v4 = vadd.f32 %v354_v3, %v181_v1 }
 0x126   :  { %400 = vst [vmem:[#allocation10 + $0x8] sm:$0xff] %v398_v2  ;;  %v382_v6 = vpop.f32.mrf.mxu0 }
 0x127   :  { %v367_v5 = vpop.f32.mrf.mxu3 }
 0x128   :  { %v368_v7 = vadd.f32 %v367_v5, %v355_v4 }
 0x129   :  { %v395_v8 = vpop.f32.mrf.mxu1 }
 0x12a   :  { %v397_v9 = vmax.f32 %v368_v7, 0.0 }
 0x12c   :  { %399 = vst [vmem:[#allocation10] sm:$0xff] %v397_v9  ;;  %v356_v10 = vpop.f32.mrf.mxu2 }
 0x12d   :  { %411 = dma.vmem_to_hbm [thread:$0]  %s407_s14, 256, %s409_s17, [#allocation4]  }
 0x12f   :  { %v369_v11 = vpop.f32.mrf.mxu3 }
 0x130   :  { %735 = dma.done.wait [#allocation4], 256  }
 0x131   :  { %736 = vsyncadd [#allocation4], 4294967040 }
 0x132   :  { %416 = vsyncpa [#allocation3], 1 }
 0x133   :  { %417 = vsyncpa [#allocation6], 1 }
 0x134   :  { %418 = vsyncpa [#allocation9], 1 }
 0x135   :  { %419 = vsyncpa [#allocation4], 1 }

</bundles_post_ra>
